<compile_context>
chip_gen: v7x
topology: tpu7x:2x2x1
jax: 0.10.0
libtpu: 0.0.40
codegen_flags: <defaults>
</compile_context>

<pallas_src>
import functools

import numpy as np
import jax
import jax.numpy as jnp
from jax.experimental import pallas as pl
from jax.experimental.pallas import tpu as pltpu

BOND_FEATURE_DIMS = [5, 6, 2]      # len(possible_bond_type/stereo/is_conjugated)
FEATURE_OFFSETS = [0, 5, 11]       # cumulative offsets into the concatenated table
NUM_FEATURES = 3
PADDED_ROWS = 16                   # 13 real rows padded up (multiple of 8)


def _round_up(x, m):
    return ((x + m - 1) // m) * m


# ----------------------------------------------------------------------------
# Kernel
# ----------------------------------------------------------------------------
def bond_encoder_kernel(attr_ref, sel_ref, tgt_ref, table_ref, out_ref):
    """One tile of lane-packed edges.

    attr_ref : (T, g*3)    int32  packed edge indices (g edges per row)
    sel_ref  : (g*3, g*16) f32    static 0/1 selector (index column -> lane slot)
    tgt_ref  : (1, g*16)   f32    per-lane match target (-1 on pad lanes)
    table_ref: (g*16, g*D) f32    block-diagonal concatenated embedding table
    out_ref  : (T, g*D)           summed embeddings, g edges per row
    """
    idx = attr_ref[...].astype(jnp.float32)                     # (T, g*3), exact
    # Replicate each index into its feature's 16-lane slot via the (idle) MXU.
    # Values are tiny integers, exact in any matmul precision.
    sel = jnp.dot(idx, sel_ref[...],
                  preferred_element_type=jnp.float32)            # (T, g*16)
    # One compare + one cast builds the whole multi-hot "counts" matrix.
    counts = (sel == tgt_ref[...]).astype(jnp.float32)           # (T, g*16)
    # counts @ table == sum_i table_i[idx_i]; pin f32 precision so table values
    # are never truncated to a single bf16 MXU pass.
    out = jnp.dot(counts, table_ref[...],
                  preferred_element_type=jnp.float32,
                  precision=jax.lax.Precision.HIGHEST)
    out_ref[...] = out.astype(out_ref.dtype)


# ----------------------------------------------------------------------------
# Static operands
# ----------------------------------------------------------------------------
def _build_selector(g):
    """Selector S (g*3, g*16) and per-lane compare target (1, g*16)."""
    s = np.zeros((g * NUM_FEATURES, g * PADDED_ROWS), np.float32)
    tgt = np.full((1, g * PADDED_ROWS), -1.0, np.float32)       # pad lanes never match
    for gi in range(g):
        for f, (off, dim) in enumerate(zip(FEATURE_OFFSETS, BOND_FEATURE_DIMS)):
            for local in range(dim):
                r = gi * PADDED_ROWS + off + local
                s[gi * NUM_FEATURES + f, r] = 1.0
                tgt[0, r] = float(local)
    return jnp.asarray(s), jnp.asarray(tgt)


def _block_diag_table(table_cat, g):
    """(16, D) concatenated table -> (g*16, g*D) block-diagonal table."""
    r, d = table_cat.shape
    if g == 1:
        return table_cat
    table_bd = jnp.zeros((g * r, g * d), table_cat.dtype)
    for gi in range(g):
        table_bd = table_bd.at[gi * r:(gi + 1) * r, gi * d:(gi + 1) * d].set(table_cat)
    return table_bd


def make_bond_embedding_tables(emb_dim, key):
    """Xavier-uniform init, matching nn.init.xavier_uniform_ on (num_emb, emb_dim)."""
    tables = []
    for dim in BOND_FEATURE_DIMS:
        key, sub = jax.random.split(key)
        bound = (6.0 / (dim + emb_dim)) ** 0.5
        tables.append(
            jax.random.uniform(sub, (dim, emb_dim), jnp.float32, -bound, bound))
    return tables


def pack_tables(tables, emb_dim):
    """Concatenate the 3 tables into a (PADDED_ROWS, emb_dim) f32 table."""
    table_cat = jnp.zeros((PADDED_ROWS, emb_dim), dtype=jnp.float32)
    row = 0
    for t in tables:
        table_cat = table_cat.at[row:row + t.shape[0]].set(t)
        row += t.shape[0]
    return table_cat


# ----------------------------------------------------------------------------
# Wrapper
# ----------------------------------------------------------------------------
@functools.partial(jax.jit, static_argnames=("tile_e", "out_dtype"))
def bond_encoder(edge_attr, table_cat, *, tile_e=None, out_dtype=jnp.float32):
    """edge_attr: (E, 3) int, table_cat: (16, D) f32 -> (E, D) out_dtype."""
    e, f = edge_attr.shape
    r, d = table_cat.shape
    assert f == NUM_FEATURES and r == PADDED_ROWS

    out_bytes = np.dtype(out_dtype).itemsize
    # Lane packing: g edges per output row so packed output last dim is 128.
    g = (128 // d) if (d < 128 and 128 % d == 0) else 1
    min_rows = 8 if out_bytes == 4 else 16          # sublane quantum for the out block
    min_edges = min_rows * g

    # --- block size: target ~4 MiB of output per grid step (HBM roofline),
    # but keep >= 2 grid steps so both v7x TensorCores get work. ---------------
    if tile_e is None:
        target_block_bytes = 4 << 20
        tile_e = max(min_edges, target_block_bytes // (d * out_bytes))

    e_pad = _round_up(e, min_edges)                 # pad only to the packing quantum
    if e_pad != e:
        # Padded edges use index 0 (valid rows); their outputs are sliced off below.
        edge_attr = jnp.pad(edge_attr, ((0, e_pad - e), (0, 0)))
    rows = e_pad // g                               # packed rows (multiple of min_rows)

    t_rows = _round_up(max(tile_e // g, min_rows), min_rows)
    half = _round_up(pl.cdiv(rows, 2), min_rows)    # cap so grid >= 2 when possible
    t_rows = max(min_rows, min(t_rows, half, rows))
    grid = pl.cdiv(rows, t_rows)                    # ragged last block is clipped

    # (E_pad, 3) -> (E_pad/g, g*3): free row-major reshape.
    attr_packed = edge_attr.astype(jnp.int32).reshape(rows, g * f)
    sel_mat, lane_tgt = _build_selector(g)
    table_bd = _block_diag_table(table_cat, g)

    # --- VMEM budget: double-buffered in/out blocks + resident constants +
    # in-kernel temporaries (idx_f32 / sel / counts) + headroom. ---------------
    in_block = t_rows * (g * f) * 4
    out_block = t_rows * (g * d) * out_bytes
    const_bytes = int(sel_mat.size + lane_tgt.size + table_bd.size) * 4
    temp_bytes = 4 * t_rows * (g * PADDED_ROWS) * 4
    budget = 2 * (in_block + out_block) + 2 * const_bytes + temp_bytes + (2 << 20)
    try:
        vmem_cap = int(pltpu.get_tpu_info().vmem_capacity_bytes) - (16 << 20)
    except Exception:
        vmem_cap = 48 << 20                         # safe under v7x's 64 MiB physical
    vmem_limit = int(min(max(budget, 32 << 20), max(vmem_cap, 32 << 20)))

    out_padded = pl.pallas_call(
        bond_encoder_kernel,
        out_shape=jax.ShapeDtypeStruct((rows, g * d), out_dtype),
        grid_spec=pltpu.PrefetchScalarGridSpec(
            num_scalar_prefetch=0,
            grid=(grid,),
            in_specs=[
                pl.BlockSpec((t_rows, g * f), lambda i: (i, 0)),            # indices
                pl.BlockSpec((g * f, g * PADDED_ROWS), lambda i: (0, 0)),   # selector
                pl.BlockSpec((1, g * PADDED_ROWS), lambda i: (0, 0)),       # lane target
                pl.BlockSpec((g * PADDED_ROWS, g * d), lambda i: (0, 0)),   # table
            ],
            out_specs=pl.BlockSpec((t_rows, g * d), lambda i: (i, 0)),
        ),
        compiler_params=pltpu.CompilerParams(
            dimension_semantics=("parallel",),
            vmem_limit_bytes=vmem_limit,
        ),
        cost_estimate=pl.CostEstimate(
            flops=int(2 * rows * (g * f) * (g * PADDED_ROWS)
                      + 2 * rows * (g * PADDED_ROWS) * (g * d)),
            bytes_accessed=int(rows * (g * f) * 4 + rows * (g * d) * out_bytes
                               + const_bytes),
            transcendentals=0,
        ),
    )(attr_packed, sel_mat, lane_tgt, table_bd)

    out = out_padded.reshape(e_pad, d)     # free: (rows, g*D) row-major == (E_pad, D)
    return out[:e] if e_pad != e else out


# ----------------------------------------------------------------------------
# Pure-JAX reference and test harness
# ----------------------------------------------------------------------------
def bond_encoder_ref(edge_attr, tables):
    """Pure-JAX reference of the PyTorch forward."""
    out = 0
    for i, t in enumerate(tables):
        out = out + jnp.take(t, edge_attr[:, i], axis=0)
    return out


def _make_edge_attr(key, num_edges):
    cols = []
    for dim in BOND_FEATURE_DIMS:
        key, sub = jax.random.split(key)
        cols.append(jax.random.randint(sub, (num_edges, 1), 0, dim, jnp.int32))
    return jnp.concatenate(cols, axis=1)


if __name__ == "__main__":
    key = jax.random.PRNGKey(0)

    def run_case(emb_dim, num_edges, key, out_dtype=jnp.float32, atol=1e-5):
        k_tab, k_idx, key = jax.random.split(key, 3)
        tables = make_bond_embedding_tables(emb_dim, k_tab)
        table_cat = pack_tables(tables, emb_dim)
        edge_attr = _make_edge_attr(k_idx, num_edges)
        out = jax.block_until_ready(
            bond_encoder(edge_attr, table_cat, out_dtype=out_dtype))
        ref = bond_encoder_ref(edge_attr, tables)
        assert out.shape == (num_edges, emb_dim)
        assert jnp.allclose(out.astype(jnp.float32), ref, atol=atol), (
            f"mismatch vs reference (D={emb_dim}, E={num_edges}, dtype={out_dtype})")
        return key

    # 1) small emb_dim -> lane-packed path (g = 4), grid of 2 blocks.
    key = run_case(32, 300, key)
    # 2) wide emb_dim -> g = 1 path with a ragged (clipped) last block.
    key = run_case(256, 200, key)
    # 3) OGB default emb_dim=300 (not a multiple of 128; masked trailing stores).
    key = run_case(300, 250, key)
    # 4) optional bf16-store variant (looser tolerance).
    key = run_case(32, 300, key, out_dtype=jnp.bfloat16, atol=2e-2)

    print("KERNEL_OK")
</pallas_src>

<mosaic_0001>
module attributes {stable_mosaic.version = 11 : i64} {
  func.func @bond_encoder_kernel(%arg0: i32, %arg1: memref<40x12xi32, #tpu.memory_space<vmem>>, %arg2: memref<12x64xf32, #tpu.memory_space<vmem>>, %arg3: memref<1x64xf32, #tpu.memory_space<vmem>>, %arg4: memref<64x128xf32, #tpu.memory_space<vmem>>, %arg5: memref<40x128xf32, #tpu.memory_space<vmem>>) attributes {dimension_semantics = [#tpu.dimension_semantics<parallel>], iteration_bounds = array<i64: 2>, scalar_prefetch = 0 : i64, scratch_operands = 0 : i64, tpu.core_type = #tpu.core_type<tc>, window_params = [{transform_indices = @transform_0, window_bounds = array<i64: 40, 12>}, {pipeline_mode = #tpu.pipeline_mode<synchronous>, transform_indices = @transform_1, window_bounds = array<i64: 12, 64>}, {pipeline_mode = #tpu.pipeline_mode<synchronous>, transform_indices = @transform_2, window_bounds = array<i64: 1, 64>}, {pipeline_mode = #tpu.pipeline_mode<synchronous>, transform_indices = @transform_3, window_bounds = array<i64: 64, 128>}, {transform_indices = @transform_4, window_bounds = array<i64: 40, 128>}]} {
    %c0 = arith.constant 0 : index
    %c0_0 = arith.constant 0 : index
    %0 = vector.load %arg1[%c0, %c0_0] : memref<40x12xi32, #tpu.memory_space<vmem>>, vector<40x12xi32>
    %1 = arith.sitofp %0 : vector<40x12xi32> to vector<40x12xf32>
    %c0_1 = arith.constant 0 : index
    %c0_2 = arith.constant 0 : index
    %2 = vector.load %arg2[%c0_1, %c0_2] : memref<12x64xf32, #tpu.memory_space<vmem>>, vector<12x64xf32>
    %cst = arith.constant dense<0.000000e+00> : vector<40x64xf32>
    %3 = tpu.matmul %1, %2, %cst {dimension_numbers = #tpu.dot_dimension_numbers<[1], [0], [0], [1], [0, 0, 1, 1], [], []>} : vector<40x12xf32>, vector<12x64xf32>, vector<40x64xf32> -> vector<40x64xf32>
    %c0_3 = arith.constant 0 : index
    %c0_4 = arith.constant 0 : index
    %4 = vector.load %arg3[%c0_3, %c0_4] : memref<1x64xf32, #tpu.memory_space<vmem>>, vector<1x64xf32>
    %5 = vector.broadcast %4 : vector<1x64xf32> to vector<40x64xf32>
    %6 = arith.cmpf oeq, %3, %5 : vector<40x64xf32>
    %7 = arith.extui %6 : vector<40x64xi1> to vector<40x64xi32>
    %8 = arith.sitofp %7 : vector<40x64xi32> to vector<40x64xf32>
    %c0_5 = arith.constant 0 : index
    %c0_6 = arith.constant 0 : index
    %9 = vector.load %arg4[%c0_5, %c0_6] : memref<64x128xf32, #tpu.memory_space<vmem>>, vector<64x128xf32>
    %cst_7 = arith.constant dense<0.000000e+00> : vector<40x128xf32>
    %10 = tpu.matmul %8, %9, %cst_7 {dimension_numbers = #tpu.dot_dimension_numbers<[1], [0], [0], [1], [0, 0, 1, 1], [], []>, precision = #tpu.contract_precision<fp32>} : vector<40x64xf32>, vector<64x128xf32>, vector<40x128xf32> -> vector<40x128xf32>
    %c0_8 = arith.constant 0 : index
    %c0_9 = arith.constant 0 : index
    %11 = vector.load %arg5[%c0_8, %c0_9] : memref<40x128xf32, #tpu.memory_space<vmem>>, vector<40x128xf32>
    tpu.vector_store %arg5[%c0_8, %c0_9], %10 {strides = array<i32>} : memref<40x128xf32, #tpu.memory_space<vmem>>, vector<40x128xf32>,
    return
  }
  func.func @transform_0(%arg0: i32) -> (i32, i32) {
    %c0_i32 = arith.constant 0 : i32
    %c0_i32_0 = arith.constant 0 : i32
    return %arg0, %c0_i32 : i32, i32
  }
  func.func @transform_1(%arg0: i32) -> (i32, i32) {
    %c0_i32 = arith.constant 0 : i32
    %c0_i32_0 = arith.constant 0 : i32
    %c0_i32_1 = arith.constant 0 : i32
    return %c0_i32, %c0_i32_0 : i32, i32
  }
  func.func @transform_2(%arg0: i32) -> (i32, i32) {
    %c0_i32 = arith.constant 0 : i32
    %c0_i32_0 = arith.constant 0 : i32
    %c0_i32_1 = arith.constant 0 : i32
    return %c0_i32, %c0_i32_0 : i32, i32
  }
  func.func @transform_3(%arg0: i32) -> (i32, i32) {
    %c0_i32 = arith.constant 0 : i32
    %c0_i32_0 = arith.constant 0 : i32
    %c0_i32_1 = arith.constant 0 : i32
    return %c0_i32, %c0_i32_0 : i32, i32
  }
  func.func @transform_4(%arg0: i32) -> (i32, i32) {
    %c0_i32 = arith.constant 0 : i32
    %c0_i32_0 = arith.constant 0 : i32
    return %arg0, %c0_i32 : i32, i32
  }
}

</mosaic_0001>

<bundles_post_ra>
// kernel: bond_encoder.1
= control target key start
LH: loop header
LB: loop body
LE: loop exit
PB: predicated region body
PF: predicated region fallthrough
CT: control target
= control target key end

     0   :  { %s1639_s15 = smov 0   ;;  %s1973_s0 = inlined_call_operand.vmem [shape: s32[80,12], index: 0, kind: input, shape index: {}]   ;;  %s1974_s1 = inlined_call_operand.vmem [shape: f32[12,64], index: 1, kind: input, shape index: {}]   ;;  %s1975_s2 = inlined_call_operand.vmem [shape: f32[1,64], index: 2, kind: input, shape index: {}]   ;;  %s1976_s3 = inlined_call_operand.vmem [shape: f32[64,128], index: 3, kind: input, shape index: {}]   ;;  %s1977_s4 = inlined_call_operand.vmem [shape: f32[80,128], index: 4, kind: output, shape index: {}]  }
   0x1 LB: > { %s1139_s16 = sadd.s32 4294967295, %s1608_s15   ;;  %p1143_p0 = scmp.ge.s32.totalorder %s1608_s15, 1  ;;  %s1608_s15 = sphi %s1639_s15, %s14_s15  }
   0x2   : > { %p163_p1 = scmp.lt.s32.totalorder %s1608_s15, 3 }
   0x4   : > { %p164_p2 = pnand %p1143_p0, %p163_p1 }
   0x5   : > { %v211_v0 = vld [vmem:[%s1974_s1] sm:$0xff] (!%p164_p2)  ;;  %v212_v1 = vld [vmem:[%s1974_s1 + $0x8] sm:$0xf] (!%p164_p2)  ;;  %vm229_vm0 = vcmask (!%p164_p2), 1043456   ;;  %v1610_v2 = vmov (!%p164_p2), 0.0|0.0   ;;  %vm1611_vm1 = vmmov (!%p164_p2), 1  }
   0x6   : > { %167 = sbr.rel (%p164_p2) target bundleno = 515 (0x203), region = 36  ;;  %1465 = vmatprep.subr.bf16.mxu0 (!%p164_p2), %v1610_v2  ;;  %v1466_v3 = vpack.c.bf16 (!%p164_p2), %v212_v1, %v211_v0  ;;  %vm1467_vm2 = vmpackc.low (!%p164_p2), %vm229_vm0, %vm1611_vm1  ;;  %1493 = vmatprep.subr.bf16.mxu1 (!%p164_p2), %v1610_v2  ;;  %v345_v4 = vld [vmem:[%s1976_s3] sm:$0xff] (!%p164_p2)  ;;  %v346_v5 = vld [vmem:[%s1976_s3 + $0x8] sm:$0xff] (!%p164_p2)  ;;  %vm1612_vm3 = vmmov (!%p164_p2), 0   ;;  %v1613_v6 = vmov (!%p164_p2), 0.0   ;;  %vm213_vm4 = vcmask (!%p164_p2), 97280  }
   0x7   : > { %s189_s21 = smul.u32 (!%p164_p2), 5, %s1139_s16  ;;  %1264 = vmatprep.mubr.msk.f32.mxu0 (!%p164_p2), %vm1612_vm3, %v1613_v6  ;;  %v370_v7 = vand.u32 (!%p164_p2), 4294901760, %v345_v4  ;;  %v373_v8 = vand.u32 (!%p164_p2), 4294901760, %v346_v5  ;;  %v347_v9 = vld [vmem:[%s1976_s3 + $0x10] sm:$0xff] (!%p164_p2)  ;;  %v348_v10 = vld [vmem:[%s1976_s3 + $0x18] sm:$0xff] (!%p164_p2)  ;;  %v1672_v11 = vld [vmem:[%s1976_s3 + $0x20] sm:$0xff] (!%p164_p2)  ;;  %1357 = vmatprep.mubr.msk.f32.mxu1 (!%p164_p2), %vm1612_vm3, %v1613_v6 }
   0x8   : > { %1468 = vmatpush3.bf16.msk.msra.mxu0 (!%p164_p2), %vm1467_vm2, %v1466_v3  ;;  %v376_v12 = vand.u32 (!%p164_p2), 4294901760, %v347_v9  ;;  %v379_v13 = vand.u32 (!%p164_p2), 4294901760, %v348_v10  ;;  %v350_v14 = vld [vmem:[%s1976_s3 + $0x28] sm:$0xff] (!%p164_p2)  ;;  %v382_v17 = vand.u32 (!%p164_p2), 4294901760, %v1672_v11  ;;  %v351_v37 = vld [vmem:[%s1976_s3 + $0x30] sm:$0xff] (!%p164_p2)  ;;  %v352_v38 = vld [vmem:[%s1976_s3 + $0x38] sm:$0xff] (!%p164_p2) }
   0x9   : > { %p190_p3 = scmp.lt.s32.totalorder (!%p164_p2), %s189_s21, 9  ;;  %v1679_v15 = vsub.f32 (!%p164_p2), %v345_v4, %v370_v7  ;;  %v1681_v16 = vsub.f32 (!%p164_p2), %v346_v5, %v373_v8  ;;  %1469 = vmatprep.subr.bf16.mxu0 (!%p164_p2), %v1610_v2  ;;  %v385_v18 = vand.u32 (!%p164_p2), 4294901760, %v350_v14  ;;  %v1707_v27 = vpack.c.bf16 (!%p164_p2), %v373_v8, %v370_v7  ;;  %v1758_v57 = vld [vmem:[%s1975_s2] ss:$0 sm:$0xff] (!%p164_p2) }
   0xa   : > { %v1687_v19 = vsub.f32 (!%p164_p2), %v347_v9, %v376_v12  ;;  %v1689_v20 = vsub.f32 (!%p164_p2), %v348_v10, %v379_v13  ;;  %v1702_v23 = vsub.f32 (!%p164_p2), %v1672_v11, %v382_v17  ;;  %v388_v39 = vand.u32 (!%p164_p2), 4294901760, %v351_v37 }
   0xb   : > { %v1494_v21 = vpack.c.bf16 (!%p164_p2), %v1681_v16, %v1679_v15  ;;  %v1704_v24 = vsub.f32 (!%p164_p2), %v350_v14, %v385_v18  ;;  %v391_v40 = vand.u32 (!%p164_p2), 4294901760, %v352_v38  ;;  %v1736_v41 = vpack.c.bf16 (!%p164_p2), %v379_v13, %v376_v12 }
   0xc   : > { %v1497_v22 = vpack.c.bf16 (!%p164_p2), %v1689_v20, %v1687_v19  ;;  %v536_v42 = vsub.f32 (!%p164_p2), %v351_v37, %v388_v39  ;;  %v1740_v45 = vpack.c.bf16 (!%p164_p2), %v385_v18, %v382_v17  ;;  %v495_v55 = vand.u32 (!%p164_p2), 4294901760, %v1679_v15 }
   0xd   : > { %s1979_s21 = smov (!%p190_p3, %s189_s21), 9  ;;  %1495 = vmatpush3.bf16.msra.mxu1 %v1494_v21  ;;  %v1500_v30 = vpack.c.bf16 %v1704_v24, %v1702_v23  ;;  %v543_v43 = vsub.f32 %v352_v38, %v391_v40  ;;  %v1745_v46 = vpack.c.bf16 %v391_v40, %v388_v39  ;;  %v502_v56 = vand.u32 4294901760, %v1681_v16 }
   0xe   : > { %s1144_s8 = sshll.u32 %s1979_s21, 3  ;;  %1496 = vmatprep.subr.bf16.mxu1 %v1610_v2  ;;  %v537_v47 = vand.u32 4294901760, %v536_v42  ;;  %vm353_vm5 = vcmask 523264   ;;  %v496_v59 = vsub.f32 %v1679_v15, %v495_v55  ;;  %v509_v61 = vand.u32 4294901760, %v1687_v19 }
   0xf   : > { %s193_s11 = scalar_lea.vmem %s1973_s0, %s1144_s8  ;;  %v1503_v44 = vpack.c.bf16 %v543_v43, %v536_v42  ;;  %v544_v48 = vand.u32 4294901760, %v543_v43  ;;  %v503_v60 = vsub.f32 %v1681_v16, %v502_v56  ;;  %v516_v63 = vand.u32 4294901760, %v1689_v20  ;;  %s199_s22 = scalar_lea.vmem %s1977_s4, %s1144_s8 }
  0x10   : > { %v201_v25 = vld [vmem:[%s193_s11] sm:$0xff]  ;;  %v202_v26 = vld [vmem:[%s193_s11 + $0x8] sm:$0xff]  ;;  %v203_v31 = vld [vmem:[%s193_s11 + $0x10] sm:$0xff]  ;;  %v538_v49 = vsub.f32 %v536_v42, %v537_v47  ;;  %v497_v5 = vand.u32 4294901760, %v496_v59  ;;  %v510_v8 = vsub.f32 %v1687_v19, %v509_v61  ;;  %v523_v11 = vand.u32 4294901760, %v1702_v23 }
  0x11   : > { %v206_v28 = vcvt.s32.f32 %v201_v25  ;;  %v207_v29 = vcvt.s32.f32 %v202_v26  ;;  %1498 = vmatpush3.bf16.msra.mxu1 %v1497_v22  ;;  %v208_v32 = vcvt.s32.f32 %v203_v31  ;;  %v204_v33 = vld [vmem:[%s193_s11 + $0x18] sm:$0xff]  ;;  %v205_v35 = vld [vmem:[%s193_s11 + $0x20] sm:$0xff]  ;;  %v545_v50 = vsub.f32 %v543_v43, %v544_v48 }
  0x12   : > { %1499 = vmatprep.subr.bf16.mxu1 %v1610_v2  ;;  %v209_v34 = vcvt.s32.f32 %v204_v33  ;;  %v210_v36 = vcvt.s32.f32 %v205_v35  ;;  %v539_v51 = vand.u32 4294901760, %v538_v49  ;;  %v1751_v54 = vpack.c.bf16 %v544_v48, %v537_v47 }
  0x13   : > { %1265 = vmatmul.mubr.msk.f32.vlgmr.msra.gmra.mrb[0].mxu0 %vm213_vm4, %v206_v28  ;;  %v546_v52 = vand.u32 4294901760, %v545_v50  ;;  %v504_v7 = vand.u32 4294901760, %v503_v60  ;;  %v517_v10 = vsub.f32 %v1689_v20, %v516_v63  ;;  %v530_v12 = vand.u32 4294901760, %v1704_v24 }
  0x14   : > { %1267 = vmatprep.mubr.msk.f32.mxu0 %vm1612_vm3, %v1613_v6  ;;  %1471 = vmatpush3.bf16.msra.mxu0 %v1707_v27  ;;  %v511_v26 = vand.u32 4294901760, %v510_v8  ;;  %v1521_v15 = vpack.c.bf16 %v516_v63, %v509_v61 }
  0x15   : > { %1472 = vmatprep.subr.bf16.mxu0 %v1610_v2  ;;  %1501 = vmatpush3.bf16.msra.mxu1 %v1500_v30  ;;  %v1749_v53 = vpack.c.bf16 %v546_v52, %v539_v51  ;;  %v1482_v25 = vpack.c.bf16 %v504_v7, %v497_v5  ;;  %v524_v30 = vsub.f32 %v1702_v23, %v523_v11 }
  0x16   : > { %1502 = vmatprep.subr.bf16.mxu1 %v1610_v2  ;;  %v531_v31 = vsub.f32 %v1704_v24, %v530_v12  ;;  %v1524_v16 = vpack.c.bf16 %v530_v12, %v523_v11 }
  0x17   : > { %1268 = vmatmul.mubr.msk.f32.gmra.mrb[2].mxu0 %vm213_vm4, %v207_v29  ;;  %v518_v29 = vand.u32 4294901760, %v517_v10  ;;  %v525_v42 = vand.u32 4294901760, %v524_v30 }
  0x18   : > { %1270 = vmatprep.mubr.msk.f32.mxu0 %vm1612_vm3, %v1613_v6  ;;  %1474 = vmatpush3.bf16.msra.mxu0 %v1736_v41  ;;  %v532_v43 = vand.u32 4294901760, %v531_v31 }
  0x19   : > { %1475 = vmatprep.subr.bf16.mxu0 %v1610_v2  ;;  %1504 = vmatpush3.bf16.msra.mxu1 %v1503_v44  ;;  %v1485_v40 = vpack.c.bf16 %v518_v29, %v511_v26 }
  0x1a   : > { %1505 = vmatprep.subr.bf16.mxu1 %v1610_v2  ;;  %v1488_v59 = vpack.c.bf16 %v532_v43, %v525_v42 }
  0x1b   : > { %1271 = vmatmul.mubr.msk.f32.gmra.mrb[4].mxu0 %vm213_vm4, %v208_v32 }
  0x1c   : > { %1273 = vmatprep.mubr.msk.f32.mxu0 %vm1612_vm3, %v1613_v6  ;;  %1477 = vmatpush3.bf16.msra.mxu0 %v1740_v45 }
  0x1d   : > { %1478 = vmatprep.subr.bf16.mxu0 %v1610_v2 }
  0x1f   : > { %1274 = vmatmul.mubr.msk.f32.gmra.mrb[6].mxu0 %vm213_vm4, %v209_v34 }
  0x20   : > { %1276 = vmatprep.mubr.msk.f32.mxu0 %vm1612_vm3, %v1613_v6  ;;  %1480 = vmatpush3.bf16.msra.mxu0 %v1745_v46 }
  0x21   : > { %1481 = vmatprep.subr.bf16.mxu0 %v1610_v2 }
  0x23   : > { %1277 = vmatmul.mubr.msk.f32.gmra.mrb[8].mxu0 %vm213_vm4, %v210_v36 }
  0x24   : > { %1295 = vmatprep.mubr.msk.f32.mxu0 %vm1612_vm3, %v1613_v6 }
  0xe6   : > { %v299_v58 = vpop.f32.mrb[0].mxu0 }
  0xe7   : > { %vm330_vm6 = vcmp.eq.f32.partialorder %v299_v58, %v1758_v57  ;;  %v1266_v62 = vpop.f32.mrb[1].mxu0 }
  0xe8   : > { %v1770_v0 = vsel %vm330_vm6, 1.0, %v1613_v6 }
  0xe9   : > { %v355_v1 = vsel %vm353_vm5, %v1770_v0, 0 }
  0xea   : > { %v304_v3 = vpop.f32.mrb[2].mxu0  ;;  %v1774_v4 = vsub.f32 %v355_v1, %v355_v1 }
  0xeb   : > { %vm331_vm7 = vcmp.eq.f32.partialorder %v304_v3, %v1758_v57  ;;  %v1269_v9 = vpop.f32.mrb[3].mxu0 }
  0xec   : > { %v1786_v13 = vsel %vm331_vm7, 1.0, %v1613_v6  ;;  %v444_v14 = vand.u32 4294901760, %v1774_v4  ;;  %1358 = vmatmul.mubr.f32.vlgmr.msra.gmra.mrb[0].mxu1 %v1774_v4  ;;  %v1518_v9 = vpack.c.bf16 %v502_v56, %v495_v55 }
  0xed   : > { %1507 = vmatpush3.bf16.msra.mxu1 %v1707_v27  ;;  %1360 = vmatprep.mubr.msk.f32.mxu1 %vm1612_vm3, %v1613_v6  ;;  %v358_v17 = vsel %vm353_vm5, %v1786_v13, 0 }
  0xee   : > { %v445_v18 = vsub.f32 %v1774_v4, %v444_v14  ;;  %v309_v21 = vpop.f32.mrb[4].mxu0  ;;  %v1798_v22 = vsub.f32 %v358_v17, %v358_v17  ;;  %1508 = vmatprep.subr.bf16.mxu1 %v1610_v2 }
  0xef   : > { %vm332_vm8 = vcmp.eq.f32.partialorder %v309_v21, %v1758_v57  ;;  %v1272_v28 = vpop.f32.mrb[5].mxu0 }
  0xf0   : > { %v446_v32 = vand.u32 4294901760, %v445_v18  ;;  %v1809_v33 = vsel %vm332_vm8, 1.0, %v1613_v6  ;;  %1361 = vmatmul.mubr.f32.gmra.mrb[2].mxu1 %v1798_v22  ;;  %v454_v34 = vand.u32 4294901760, %v1798_v22 }
  0xf1   : > { %1510 = vmatpush3.bf16.msra.mxu1 %v1736_v41  ;;  %1363 = vmatprep.mubr.msk.f32.mxu1 %vm1612_vm3, %v1613_v6  ;;  %v361_v35 = vsel %vm353_vm5, %v1809_v33, 0 }
  0xf2   : > { %v314_v36 = vpop.f32.mrb[6].mxu0  ;;  %1296 = vmatmul.mubr.f32.vlgmr.msra.gmra.mrb[10].mxu0 %v446_v32  ;;  %v1818_v37 = vsub.f32 %v361_v35, %v361_v35  ;;  %1511 = vmatprep.subr.bf16.mxu1 %v1610_v2  ;;  %v455_v38 = vsub.f32 %v1798_v22, %v454_v34 }
  0xf3   : > { %vm333_vm9 = vcmp.eq.f32.partialorder %v314_v36, %v1758_v57  ;;  %v1275_v39 = vpop.f32.mrb[7].mxu0  ;;  %1298 = vmatprep.mubr.msk.f32.mxu0 %vm1612_vm3, %v1613_v6  ;;  %1483 = vmatpush3.bf16.msra.mxu0 %v1482_v25 }
  0xf4   : > { %v1828_v44 = vsel %vm333_vm9, 1.0, %v1613_v6  ;;  %1364 = vmatmul.mubr.f32.gmra.mrb[4].mxu1 %v1818_v37  ;;  %v456_v47 = vand.u32 4294901760, %v455_v38  ;;  %v464_v48 = vand.u32 4294901760, %v1818_v37  ;;  %1484 = vmatprep.subr.bf16.mxu0 %v1610_v2 }
  0xf5   : > { %1513 = vmatpush3.bf16.msra.mxu1 %v1740_v45  ;;  %1366 = vmatprep.mubr.msk.f32.mxu1 %vm1612_vm3, %v1613_v6  ;;  %v364_v49 = vsel %vm353_vm5, %v1828_v44, 0 }
  0xf6   : > { %v319_v50 = vpop.f32.mrb[8].mxu0  ;;  %1299 = vmatmul.mubr.f32.gmra.mrb[12].mxu0 %v456_v47  ;;  %v473_v51 = vsub.f32 %v364_v49, %v364_v49  ;;  %v465_v52 = vsub.f32 %v1818_v37, %v464_v48  ;;  %1514 = vmatprep.subr.bf16.mxu1 %v1610_v2 }
  0xf7   : > { %vm334_vm10 = vcmp.eq.f32.partialorder %v319_v50, %v1758_v57  ;;  %v1278_v58 = vpop.f32.mrb[9].mxu0  ;;  %1301 = vmatprep.mubr.msk.f32.mxu0 %vm1612_vm3, %v1613_v6  ;;  %1486 = vmatpush3.bf16.msra.mxu0 %v1485_v40 }
  0xf8   : > { %v1844_v60 = vsel %vm334_vm10, 1.0, %v1613_v6  ;;  %1367 = vmatmul.mubr.f32.gmra.mrb[6].mxu1 %v473_v51  ;;  %v466_v62 = vand.u32 4294901760, %v465_v52  ;;  %v474_v1 = vand.u32 4294901760, %v473_v51  ;;  %1487 = vmatprep.subr.bf16.mxu0 %v1610_v2 }
  0xf9   : > { %1369 = vmatprep.mubr.msk.f32.mxu1 %vm1612_vm3, %v1613_v6  ;;  %1516 = vmatpush3.bf16.msra.mxu1 %v1745_v46  ;;  %v367_v57 = vsel %vm353_vm5, %v1844_v60, 0 }
  0xfa   : > { %1302 = vmatmul.mubr.f32.gmra.mrb[14].mxu0 %v466_v62  ;;  %v483_v3 = vsub.f32 %v367_v57, %v367_v57  ;;  %v475_v5 = vsub.f32 %v473_v51, %v474_v1  ;;  %1517 = vmatprep.subr.bf16.mxu1 %v1610_v2 }
  0xfb   : > { %1304 = vmatprep.mubr.msk.f32.mxu0 %vm1612_vm3, %v1613_v6  ;;  %1489 = vmatpush3.bf16.msra.mxu0 %v1488_v59 }
  0xfc   : > { %1370 = vmatmul.mubr.f32.gmra.mrb[8].mxu1 %v483_v3  ;;  %v476_v7 = vand.u32 4294901760, %v475_v5  ;;  %v484_v8 = vand.u32 4294901760, %v483_v3  ;;  %1490 = vmatprep.subr.bf16.mxu0 %v1610_v2 }
  0xfd   : > { %1388 = vmatprep.mubr.msk.f32.mxu1 %vm1612_vm3, %v1613_v6 }
  0xfe   : > { %1305 = vmatmul.mubr.f32.gmra.mrb[16].mxu0 %v476_v7  ;;  %v485_v10 = vsub.f32 %v483_v3, %v484_v8 }
  0xff   : > { %1307 = vmatprep.mubr.msk.f32.mxu0 %vm1612_vm3, %v1613_v6  ;;  %1492 = vmatpush3.bf16.msra.mxu0 %v1749_v53 }
 0x100   : > { %1389 = vmatmul.mubr.f32.vlgmr.msra.gmra.mrb[0].mxu1 %v444_v14  ;;  %v486_v17 = vand.u32 4294901760, %v485_v10  ;;  %1529 = vmatprep.subr.bf16.mxu0 %v1610_v2 }
 0x101   : > { %1519 = vmatpush3.bf16.msra.mxu1 %v1518_v9  ;;  %1391 = vmatprep.mubr.msk.f32.mxu1 %vm1612_vm3, %v1613_v6 }
 0x102   : > { %1308 = vmatmul.mubr.f32.gmra.mrb[18].mxu0 %v486_v17  ;;  %1520 = vmatprep.subr.bf16.mxu1 %v1610_v2 }
 0x103   : > { %1326 = vmatprep.mubr.msk.f32.mxu0 %vm1612_vm3, %v1613_v6 }
 0x104   : > { %1392 = vmatmul.mubr.f32.gmra.mrb[2].mxu1 %v454_v34 }
 0x105   : > { %1522 = vmatpush3.bf16.msra.mxu1 %v1521_v15  ;;  %1394 = vmatprep.mubr.msk.f32.mxu1 %vm1612_vm3, %v1613_v6 }
 0x106   : > { %1327 = vmatmul.mubr.msk.f32.vlgmr.msra.gmra.mrb[10].mxu0 %vm353_vm5, %v1770_v0  ;;  %1523 = vmatprep.subr.bf16.mxu1 %v1610_v2 }
 0x107   : > { %1329 = vmatprep.mubr.msk.f32.mxu0 %vm1612_vm3, %v1613_v6  ;;  %1531 = vmatpush3.bf16.msra.mxu0 %v1707_v27 }
 0x108   : > { %1395 = vmatmul.mubr.f32.gmra.mrb[4].mxu1 %v464_v48  ;;  %1532 = vmatprep.subr.bf16.mxu0 %v1610_v2 }
 0x109   : > { %1525 = vmatpush3.bf16.msra.mxu1 %v1524_v16  ;;  %1397 = vmatprep.mubr.msk.f32.mxu1 %vm1612_vm3, %v1613_v6 }
 0x10a   : > { %1330 = vmatmul.mubr.msk.f32.gmra.mrb[12].mxu0 %vm353_vm5, %v1786_v13  ;;  %1526 = vmatprep.subr.bf16.mxu1 %v1610_v2 }
 0x10b   : > { %1332 = vmatprep.mubr.msk.f32.mxu0 %vm1612_vm3, %v1613_v6  ;;  %1534 = vmatpush3.bf16.msra.mxu0 %v1736_v41 }
 0x10c   : > { %1398 = vmatmul.mubr.f32.gmra.mrb[6].mxu1 %v474_v1  ;;  %1535 = vmatprep.subr.bf16.mxu0 %v1610_v2 }
 0x10d   : > { %1400 = vmatprep.mubr.msk.f32.mxu1 %vm1612_vm3, %v1613_v6  ;;  %1528 = vmatpush3.bf16.msra.mxu1 %v1751_v54 }
 0x10e   : > { %1333 = vmatmul.mubr.msk.f32.gmra.mrb[14].mxu0 %vm353_vm5, %v1809_v33  ;;  %1541 = vmatprep.subr.bf16.mxu1 %v1610_v2 }
 0x10f   : > { %1335 = vmatprep.mubr.msk.f32.mxu0 %vm1612_vm3, %v1613_v6  ;;  %1537 = vmatpush3.bf16.msra.mxu0 %v1740_v45 }
 0x110   : > { %1401 = vmatmul.mubr.f32.gmra.mrb[8].mxu1 %v484_v8  ;;  %1538 = vmatprep.subr.bf16.mxu0 %v1610_v2 }
 0x111   : > { %1419 = vmatprep.mubr.msk.f32.mxu1 %vm1612_vm3, %v1613_v6 }
 0x112   : > { %1336 = vmatmul.mubr.msk.f32.gmra.mrb[16].mxu0 %vm353_vm5, %v1828_v44 }
 0x113   : > { %1338 = vmatprep.mubr.msk.f32.mxu0 %vm1612_vm3, %v1613_v6  ;;  %1540 = vmatpush3.bf16.msra.mxu0 %v1745_v46 }
 0x114   : > { %1420 = vmatmul.mubr.msk.f32.vlgmr.msra.gmra.mrb[0].mxu1 %vm353_vm5, %v1770_v0 }
 0x115   : > { %1545 = vmatpush3.bf16.msra.mxu1 %v1707_v27  ;;  %1422 = vmatprep.mubr.msk.f32.mxu1 %vm1612_vm3, %v1613_v6 }
 0x116   : > { %1339 = vmatmul.mubr.msk.f32.gmra.mrb[18].mxu0 %vm353_vm5, %v1844_v60  ;;  %1542 = vmatprep.subr.bf16.mxu1 %v1610_v2 }
 0x117   : > { %1450 = vmatprep.mubr.msk.f32.mxu0 %vm1612_vm3, %v1613_v6 }
 0x118   : > { %1423 = vmatmul.mubr.msk.f32.gmra.mrb[2].mxu1 %vm353_vm5, %v1786_v13 }
 0x119   : > { %1546 = vmatpush3.bf16.msra.mxu1 %v1736_v41  ;;  %1425 = vmatprep.mubr.msk.f32.mxu1 %vm1612_vm3, %v1613_v6 }
 0x11a   : > { %1451 = vmatmul.mubr.msk.f32.vlgmr.msra.gmra.mrb[20].mxu0 %vm353_vm5, %v1770_v0  ;;  %1543 = vmatprep.subr.bf16.mxu1 %v1610_v2 }
 0x11b   : > { %1453 = vmatprep.mubr.msk.f32.mxu0 %vm1612_vm3, %v1613_v6 }
 0x11c   : > { %1426 = vmatmul.mubr.msk.f32.gmra.mrb[4].mxu1 %vm353_vm5, %v1809_v33 }
 0x11d   : > { %1428 = vmatprep.mubr.msk.f32.mxu1 %vm1612_vm3, %v1613_v6  ;;  %1547 = vmatpush3.bf16.msra.mxu1 %v1740_v45 }
 0x11e   : > { %1454 = vmatmul.mubr.msk.f32.gmra.mrb[22].mxu0 %vm353_vm5, %v1786_v13  ;;  %1544 = vmatprep.subr.bf16.mxu1 %v1610_v2 }
 0x11f   : > { %1456 = vmatprep.mubr.msk.f32.mxu0 %vm1612_vm3, %v1613_v6 }
 0x120   : > { %1429 = vmatmul.mubr.msk.f32.gmra.mrb[6].mxu1 %vm353_vm5, %v1828_v44 }
 0x121   : > { %1431 = vmatprep.mubr.msk.f32.mxu1 %vm1612_vm3, %v1613_v6  ;;  %1548 = vmatpush3.bf16.msra.mxu1 %v1745_v46 }
 0x122   : > { %1457 = vmatmul.mubr.msk.f32.gmra.mrb[24].mxu0 %vm353_vm5, %v1809_v33 }
 0x123   : > { %1459 = vmatprep.mubr.msk.f32.mxu0 %vm1612_vm3, %v1613_v6 }
 0x124   : > { %1432 = vmatmul.mubr.msk.f32.gmra.mrb[8].mxu1 %vm353_vm5, %v1844_v60 }
 0x125   : > { %1462 = vmatprep.mubr.msk.f32.mxu1 %vm1612_vm3, %v1613_v6 }
 0x126   : > { %1460 = vmatmul.mubr.msk.f32.gmra.mrb[26].mxu0 %vm353_vm5, %v1828_v44 }
 0x12c   : > { %1463 = vmatmul.mubr.msk.f32.vlgmr.msra.gmra.mrb[8].mxu1 %vm353_vm5, %v1844_v60 }
 0x1d9   : > { %v599_v2 = vpop.f32.mrb[10].mxu0 }
 0x1da   : > { %v1328_v19 = vpop.f32.mrb[11].mxu0 }
 0x1dd   : > { %v605_v20 = vpop.f32.mrb[12].mxu0 }
 0x1de   : > { %v1331_v23 = vpop.f32.mrb[13].mxu0 }
 0x1e1   : > { %v611_v24 = vpop.f32.mrb[14].mxu0 }
 0x1e2   : > { %v1334_v27 = vpop.f32.mrb[15].mxu0 }
 0x1e5   : > { %v617_v41 = vpop.f32.mrb[16].mxu0 }
 0x1e6   : > { %v1337_v45 = vpop.f32.mrb[17].mxu0 }
 0x1e7   : > { %v947_v46 = vpop.f32.mrb[0].mxu1 }
 0x1e8   : > { %v1549_v53 = vadd.f32 %v947_v46, %v599_v2  ;;  %v1421_v54 = vpop.f32.mrb[1].mxu1 }
 0x1e9   : > { %v623_v55 = vpop.f32.mrb[18].mxu0 }
 0x1ea   : > { %v1340_v6 = vpop.f32.mrb[19].mxu0 }
 0x1eb   : > { %v953_v56 = vpop.f32.mrb[2].mxu1 }
 0x1ec   : > { %v1551_v61 = vadd.f32 %v953_v56, %v605_v20  ;;  %v1424_v63 = vpop.f32.mrb[3].mxu1 }
 0x1ed   : > { %v1050_v0 = vpop.f32.mrb[20].mxu0 }
 0x1ee   : > { %v1550_v4 = vadd.f32 %v1549_v53, %v1050_v0  ;;  %v1452_v11 = vpop.f32.mrb[21].mxu0 }
 0x1ef   : > { %v959_v12 = vpop.f32.mrb[4].mxu1 }
 0x1f0   : > { %1078 = vst [vmem:[%s199_s22] sm:$0xff] %v1550_v4  ;;  %v1553_v13 = vadd.f32 %v959_v12, %v611_v24  ;;  %v1427_v14 = vpop.f32.mrb[5].mxu1 }
 0x1f1   : > { %v1056_v18 = vpop.f32.mrb[22].mxu0 }
 0x1f2   : > { %v1552_v21 = vadd.f32 %v1551_v61, %v1056_v18  ;;  %v1455_v22 = vpop.f32.mrb[23].mxu0 }
 0x1f3   : > { %v965_v25 = vpop.f32.mrb[6].mxu1 }
 0x1f4   : > { %1079 = vst [vmem:[%s199_s22 + $0x8] sm:$0xff] %v1552_v21  ;;  %v1555_v26 = vadd.f32 %v965_v25, %v617_v41  ;;  %v1430_v28 = vpop.f32.mrb[7].mxu1 }
 0x1f5   : > { %v1062_v29 = vpop.f32.mrb[24].mxu0 }
 0x1f6   : > { %v1554_v30 = vadd.f32 %v1553_v13, %v1062_v29  ;;  %v1458_v31 = vpop.f32.mrb[25].mxu0 }
 0x1f8   : > { %1080 = vst [vmem:[%s199_s22 + $0x10] sm:$0xff] %v1554_v30 }
 0x1f9   : > { %v1068_v32 = vpop.f32.mrb[26].mxu0 }
 0x1fa   : > { %v1556_v33 = vadd.f32 %v1555_v26, %v1068_v32  ;;  %v1461_v34 = vpop.f32.mrb[27].mxu0 }
 0x1fc   : > { %1081 = vst [vmem:[%s199_s22 + $0x18] sm:$0xff] %v1556_v33 }
 0x1ff   : > { %v1074_v35 = vpop.f32.mrb[8].mxu1 }
 0x200   : > { %v1557_v36 = vadd.f32 %v1074_v35, %v623_v55  ;;  %v1464_v37 = vpop.f32.mrb[9].mxu1 }
 0x202   : > { %1082 = vst [vmem:[%s199_s22 + $0x20] sm:$0xff] %v1557_v36 }
 0x203 PF: > { %s14_s15 = sadd.s32 1, %s1608_s15  }
 0x204   : > { %p11_p4 = scmp.ge.s32.totalorder %s14_s15, 4  }
 0x206   :  { %13 = sbr.rel (!%p11_p4) target bundleno = 1 (0x1), region = 66 }

</bundles_post_ra>
